<compile_context>
chip_gen: v6e
topology: v6e:2x2x1
jax: 0.10.0
libtpu: 0.0.40
codegen_flags: <defaults>
</compile_context>

<pallas_src>
import math
import functools

import jax
import jax.numpy as jnp
from jax.experimental import pallas as pl
from jax.experimental.pallas import tpu as pltpu


# ----------------------------- Pallas kernels ------------------------------

def _linear_kernel(x_ref, w_ref, b_ref, o_ref):
    # out = x @ w + b    (w already transposed to (in, out)); bf16 in, f32 accumulate.
    o_ref[...] = jnp.dot(x_ref[...], w_ref[...],
                         preferred_element_type=jnp.float32) + b_ref[...]


def linear_pallas(x, w_t, b, *, block_m=512):
    """x: (M, K), w_t: (K, N), b: (N,) -> (M, N) f32.  Tiled over M, bf16 MXU inputs."""
    M, K = x.shape
    N = w_t.shape[1]
    x = x.astype(jnp.bfloat16)
    w_t = w_t.astype(jnp.bfloat16)
    b = b.astype(jnp.float32).reshape(1, N)

    tm = min(block_m, M)
    if tm % 8 != 0:            # block sublane dim must be a multiple of 8 or the full dim
        tm = M
    grid_m = pl.cdiv(M, tm)

    return pl.pallas_call(
        _linear_kernel,
        out_shape=jax.ShapeDtypeStruct((M, N), jnp.float32),
        grid=(grid_m,),
        in_specs=[pl.BlockSpec((tm, K), lambda i: (i, 0)),
                  pl.BlockSpec((K, N), lambda i: (0, 0)),
                  pl.BlockSpec((1, N), lambda i: (0, 0))],
        out_specs=pl.BlockSpec((tm, N), lambda i: (i, 0)),
        compiler_params=pltpu.CompilerParams(dimension_semantics=("parallel",)),
    )(x, w_t, b)


def _attn_kernel(q_ref, k_ref, v_ref, rel_ref, wout_ref, bout_ref,
                 *rest, scale, has_mask):
    if has_mask:
        mask_ref, o_ref = rest
    else:
        (o_ref,) = rest

    q = q_ref[0]                     # (H, T, D)  bf16
    k = k_ref[0]                     # (H, S, D)  bf16
    v = v_ref[0]                     # (H, S, D)  bf16

    # scores (MXU, batched over heads): (H, T, S), f32 accumulate; scale folded here.
    s = jax.lax.dot_general(q, k, (((2,), (2,)), ((0,), (0,))),
                            preferred_element_type=jnp.float32) * scale
    # relative-position logits (precomputed MXU one-hot contraction), f32.
    s = s + rel_ref[0]
    if has_mask:
        s = s + mask_ref[...]        # (T, S) broadcasts over heads; f32 mask math.

    # numerically-stable softmax over S, kept in f32.
    m = jnp.max(s, axis=-1, keepdims=True)
    p = jnp.exp(s - m)
    l = jnp.sum(p, axis=-1, keepdims=True)

    # P @ V (MXU, bf16 inputs / f32 accumulate); 1/l via EUP approximate reciprocal.
    ctx = jax.lax.dot_general(p.astype(v.dtype), v, (((2,), (1,)), ((0,), (0,))),
                              preferred_element_type=jnp.float32)      # (H, T, D)
    ctx = ctx * pl.reciprocal(l, approx=True)

    # fused out_proj: per-head (T, D) @ (D, E) slabs, summed over heads -> lane-dense (T, E)
    out_h = jax.lax.dot_general(ctx.astype(wout_ref.dtype), wout_ref[...],
                                (((2,), (1,)), ((0,), (0,))),
                                preferred_element_type=jnp.float32)    # (H, T, E)
    num_heads = out_h.shape[0]
    out = out_h[0]
    for h in range(1, num_heads):
        out = out + out_h[h]
    o_ref[0] = out + bout_ref[...]


def attention_pallas(q, k, v, rel, wout_h, bout, mask, *, scale):
    """q: (G, H, T, D); k, v: (G, H, S, D); rel: (G, H, T, S) f32; wout_h: (H, D, E);
    bout: (1, E) f32; mask: (T, S) f32 or None.  Returns (G, T, E) f32 (out_proj fused)."""
    G, H, T, D = q.shape
    S = k.shape[2]
    E = wout_h.shape[2]
    has_mask = mask is not None
    kernel = functools.partial(_attn_kernel, scale=scale, has_mask=has_mask)

    in_specs = [
        pl.BlockSpec((1, H, T, D), lambda i: (i, 0, 0, 0)),
        pl.BlockSpec((1, H, S, D), lambda i: (i, 0, 0, 0)),
        pl.BlockSpec((1, H, S, D), lambda i: (i, 0, 0, 0)),
        pl.BlockSpec((1, H, T, S), lambda i: (i, 0, 0, 0)),
        pl.BlockSpec((H, D, E), lambda i: (0, 0, 0)),
        pl.BlockSpec((1, E), lambda i: (0, 0)),
    ]
    args = [q, k, v, rel, wout_h, bout]
    if has_mask:
        in_specs.append(pl.BlockSpec((T, S), lambda i: (0, 0)))
        args.append(mask)

    # TODO(synk): flash-style S tiling (online softmax) for long sequences on v7x.
    return pl.pallas_call(
        kernel,
        out_shape=jax.ShapeDtypeStruct((G, T, E), jnp.float32),
        grid=(G,),
        in_specs=in_specs,
        out_specs=pl.BlockSpec((1, T, E), lambda i: (i, 0, 0)),
        compiler_params=pltpu.CompilerParams(dimension_semantics=("parallel",)),
    )(*args)


# ------------------------------- glue (JAX) --------------------------------

def relative_positions_bucket(relative_positions, num_buckets, max_distance):
    """Port of NgramMultiheadAttention._relative_positions_bucket (bidirectional=False)."""
    n = -relative_positions
    n = jnp.maximum(n, 0)
    max_exact = num_buckets // 2
    is_small = n < max_exact
    val_if_large = max_exact + (
        jnp.log(jnp.maximum(n.astype(jnp.float32), 1e-6) / max_exact)
        / math.log(max_distance / max_exact) * (num_buckets - max_exact))
    val_if_large = jnp.minimum(val_if_large, float(num_buckets - 1)).astype(jnp.int32)
    return jnp.where(is_small, n.astype(jnp.int32), val_if_large)


def ngram_multihead_attention_forward(query, params, i_buckets_main, i_buckets_rel,
                                      self_attn_mask, *, ngram, num_heads, num_buckets):
    # TODO(synk): dropout (p=0.0 here), incremental_state decoding, bias_k/bias_v and
    # add_zero_attn paths are not implemented (module defaults make them no-ops).
    T, B, E = query.shape
    H = num_heads
    hd = E // H
    N = ngram
    rT = T // (1 + N)
    scale = hd ** -0.5

    # ---- in_proj (tiled Pallas matmul, bf16 MXU / f32 accumulate) ----
    qkv = linear_pallas(query.reshape(T * B, E),
                        params["in_proj_weight"].T,
                        params["in_proj_bias"])                        # (T*B, 3E) f32
    qkv = qkv.reshape(T, B, 3 * E)
    q, k, v = jnp.split(qkv, 3, axis=-1)

    def to_bhtd(x):                        # (T, B, E) -> (B, H, T, hd), bf16 for the MXU
        return x.reshape(T, B, H, hd).transpose(1, 2, 0, 3).astype(jnp.bfloat16)

    q, k, v = to_bhtd(q), to_bhtd(k), to_bhtd(v)
    # split the time axis into the main stream + N prediction streams
    q = q.reshape(B, H, 1 + N, rT, hd)
    k = k.reshape(B, H, 1 + N, rT, hd)
    v = v.reshape(B, H, 1 + N, rT, hd)
    q_main, q_pred = q[:, :, 0], q[:, :, 1:]
    k_main, k_pred = k[:, :, 0], k[:, :, 1:]
    v_main, v_pred = v[:, :, 0], v[:, :, 1:]

    h_main = query[:rT]                                                # (rT, B, E)
    h_pred = query[rT:].reshape(N, rT, B, E)

    rel_w_t = params["relative_weight"].T                              # (E, NBK*H)
    rel_b = params["relative_bias"]
    # out_proj W^T split into per-head (hd, E) slabs for the fused epilogue
    wout_h = params["out_proj_weight"].T.reshape(H, hd, E).astype(jnp.bfloat16)
    bout = params["out_proj_bias"].reshape(1, E).astype(jnp.float32)

    # one-hot bucket encodings (exact 0/1 in bf16), consumed on the MXU
    oneh_main = jax.nn.one_hot(i_buckets_main, num_buckets, dtype=jnp.bfloat16)  # (B,rT,rT,NBK)
    oneh_rel = jax.nn.one_hot(i_buckets_rel, num_buckets, dtype=jnp.bfloat16)    # (B,rT,2rT,NBK)

    # ---- main stream ----
    vals_main = linear_pallas(h_main.transpose(1, 0, 2).reshape(B * rT, E), rel_w_t, rel_b)
    vals_main = vals_main.reshape(B, rT, num_buckets, H)
    vals_main = vals_main.transpose(0, 1, 3, 2).astype(jnp.bfloat16)   # (B, rT, H, NBK)
    # relative logits via MXU one-hot contraction (batched over b, t)
    rel_main = jnp.einsum('bthc,btsc->bhts', vals_main, oneh_main,
                          preferred_element_type=jnp.float32)          # (B, H, rT, rT)

    mask_main = self_attn_mask.astype(jnp.float32)                     # (rT, rT)
    attn_main = attention_pallas(q_main, k_main, v_main, rel_main,
                                 wout_h, bout, mask_main, scale=scale)  # (B, rT, E)
    attn_main = attn_main.transpose(1, 0, 2)[None]                     # (1, rT, B, E)

    # ---- ngram (predict) streams ----
    q_ng = q_pred.transpose(2, 0, 1, 3, 4).reshape(N * B, H, rT, hd)
    k_pred_t = k_pred.transpose(2, 0, 1, 3, 4)                         # (N, B, H, rT, hd)
    v_pred_t = v_pred.transpose(2, 0, 1, 3, 4)
    # TODO(synk): pass k_main/v_main separately (split-S inside the kernel) instead of
    # duplicating the main-stream K/V N times via this concat.
    k_ng = jnp.concatenate(
        [jnp.broadcast_to(k_main[None], (N, B, H, rT, hd)), k_pred_t], axis=3
    ).reshape(N * B, H, 2 * rT, hd)
    v_ng = jnp.concatenate(
        [jnp.broadcast_to(v_main[None], (N, B, H, rT, hd)), v_pred_t], axis=3
    ).reshape(N * B, H, 2 * rT, hd)

    vals_ng = linear_pallas(h_pred.transpose(0, 2, 1, 3).reshape(N * B * rT, E),
                            rel_w_t, rel_b)
    vals_ng = vals_ng.reshape(N, B, rT, num_buckets, H)
    vals_ng = vals_ng.transpose(0, 1, 2, 4, 3).astype(jnp.bfloat16)    # (N, B, rT, H, NBK)
    rel_ng = jnp.einsum('nbthc,btsc->nbhts', vals_ng, oneh_rel,
                        preferred_element_type=jnp.float32)            # (N, B, H, rT, 2rT)
    rel_ng = rel_ng.reshape(N * B, H, rT, 2 * rT)

    # ngram_mask_matrix is None in this configuration -> skip the mask add entirely.
    attn_ng = attention_pallas(q_ng, k_ng, v_ng, rel_ng,
                               wout_h, bout, None, scale=scale)        # (N*B, rT, E)
    attn_ng = attn_ng.reshape(N, B, rT, E).transpose(0, 2, 1, 3)       # (N, rT, B, E)

    attn = jnp.concatenate([attn_main, attn_ng], axis=0).reshape(T, B, E)
    return attn


# --------------------------------- driver ----------------------------------

if __name__ == "__main__":
    EMBED_DIM = 32
    NUM_HEADS = 4
    NGRAM = 2
    NUM_BUCKETS = 32
    MAX_DIST = 128
    B = 2
    REAL_T = 8
    T = (1 + NGRAM) * REAL_T

    key = jax.random.PRNGKey(0)
    k0, k1, k2, k3, k4 = jax.random.split(key, 5)

    def xavier_uniform(k, shape):
        fan_out, fan_in = shape
        bound = math.sqrt(6.0 / (fan_in + fan_out))
        return jax.random.uniform(k, shape, jnp.float32, -bound, bound)

    params = {
        "in_proj_weight": xavier_uniform(k0, (3 * EMBED_DIM, EMBED_DIM)),   # torch (out, in)
        "in_proj_bias": jnp.zeros((3 * EMBED_DIM,), jnp.float32),
        "out_proj_weight": xavier_uniform(k1, (EMBED_DIM, EMBED_DIM)),
        "out_proj_bias": jnp.zeros((EMBED_DIM,), jnp.float32),
        "relative_weight": xavier_uniform(k2, (NUM_BUCKETS * NUM_HEADS, EMBED_DIM)),
        "relative_bias": 0.02 * jax.random.normal(k3, (NUM_BUCKETS * NUM_HEADS,), jnp.float32),
    }

    query = jax.random.normal(k4, (T, B, EMBED_DIM), jnp.float32)

    # precomputed relative-position bucket indices (module's i_buckets_* inputs)
    pos = jnp.arange(1, REAL_T + 1)
    i_buckets_main = jnp.broadcast_to(
        relative_positions_bucket(pos[None, :] - pos[:, None], NUM_BUCKETS, MAX_DIST)[None],
        (B, REAL_T, REAL_T)).astype(jnp.int32)
    key_pos = jnp.concatenate([pos, pos])
    i_buckets_rel = jnp.broadcast_to(
        relative_positions_bucket(key_pos[None, :] - pos[:, None], NUM_BUCKETS, MAX_DIST)[None],
        (B, REAL_T, 2 * REAL_T)).astype(jnp.int32)

    # causal self-attention mask for the main stream (additive, finite -inf surrogate, f32)
    causal = jnp.where(jnp.arange(REAL_T)[None, :] > jnp.arange(REAL_T)[:, None],
                       -1e9, 0.0).astype(jnp.float32)

    out = ngram_multihead_attention_forward(
        query, params, i_buckets_main, i_buckets_rel, causal,
        ngram=NGRAM, num_heads=NUM_HEADS, num_buckets=NUM_BUCKETS)
    out = jax.block_until_ready(out)

    assert out.shape == (T, B, EMBED_DIM), out.shape
    assert bool(jnp.all(jnp.isfinite(out)))
    print("KERNEL_OK")
</pallas_src>

<mosaic_0001>
module attributes {stable_mosaic.version = 11 : i64} {
  func.func @_linear_kernel(%arg0: i32, %arg1: memref<48x32xbf16, #tpu.memory_space<vmem>>, %arg2: memref<32x96xbf16, #tpu.memory_space<vmem>>, %arg3: memref<1x96xf32, #tpu.memory_space<vmem>>, %arg4: memref<48x96xf32, #tpu.memory_space<vmem>>) attributes {dimension_semantics = [#tpu.dimension_semantics<parallel>], iteration_bounds = array<i64: 1>, scalar_prefetch = 0 : i64, scratch_operands = 0 : i64, tpu.core_type = #tpu.core_type<tc>, window_params = [{transform_indices = @transform_0, window_bounds = array<i64: 48, 32>}, {pipeline_mode = #tpu.pipeline_mode<synchronous>, transform_indices = @transform_1, window_bounds = array<i64: 32, 96>}, {pipeline_mode = #tpu.pipeline_mode<synchronous>, transform_indices = @transform_2, window_bounds = array<i64: 1, 96>}, {transform_indices = @transform_3, window_bounds = array<i64: 48, 96>}]} {
    %c0 = arith.constant 0 : index
    %c0_0 = arith.constant 0 : index
    %0 = vector.load %arg1[%c0, %c0_0] : memref<48x32xbf16, #tpu.memory_space<vmem>>, vector<48x32xbf16>
    %c0_1 = arith.constant 0 : index
    %c0_2 = arith.constant 0 : index
    %1 = vector.load %arg2[%c0_1, %c0_2] : memref<32x96xbf16, #tpu.memory_space<vmem>>, vector<32x96xbf16>
    %cst = arith.constant dense<0.000000e+00> : vector<48x96xf32>
    %2 = tpu.matmul %0, %1, %cst {dimension_numbers = #tpu.dot_dimension_numbers<[1], [0], [0], [1], [0, 0, 1, 1], [], []>} : vector<48x32xbf16>, vector<32x96xbf16>, vector<48x96xf32> -> vector<48x96xf32>
    %c0_3 = arith.constant 0 : index
    %c0_4 = arith.constant 0 : index
    %3 = vector.load %arg3[%c0_3, %c0_4] : memref<1x96xf32, #tpu.memory_space<vmem>>, vector<1x96xf32>
    %4 = vector.broadcast %3 : vector<1x96xf32> to vector<48x96xf32>
    %5 = arith.addf %2, %4 : vector<48x96xf32>
    %c0_5 = arith.constant 0 : index
    %c0_6 = arith.constant 0 : index
    %6 = vector.load %arg4[%c0_5, %c0_6] : memref<48x96xf32, #tpu.memory_space<vmem>>, vector<48x96xf32>
    tpu.vector_store %arg4[%c0_5, %c0_6], %5 {strides = array<i32>} : memref<48x96xf32, #tpu.memory_space<vmem>>, vector<48x96xf32>,
    return
  }
  func.func @transform_0(%arg0: i32) -> (i32, i32) {
    %c0_i32 = arith.constant 0 : i32
    %c0_i32_0 = arith.constant 0 : i32
    return %arg0, %c0_i32 : i32, i32
  }
  func.func @transform_1(%arg0: i32) -> (i32, i32) {
    %c0_i32 = arith.constant 0 : i32
    %c0_i32_0 = arith.constant 0 : i32
    %c0_i32_1 = arith.constant 0 : i32
    return %c0_i32, %c0_i32_0 : i32, i32
  }
  func.func @transform_2(%arg0: i32) -> (i32, i32) {
    %c0_i32 = arith.constant 0 : i32
    %c0_i32_0 = arith.constant 0 : i32
    %c0_i32_1 = arith.constant 0 : i32
    return %c0_i32, %c0_i32_0 : i32, i32
  }
  func.func @transform_3(%arg0: i32) -> (i32, i32) {
    %c0_i32 = arith.constant 0 : i32
    %c0_i32_0 = arith.constant 0 : i32
    return %arg0, %c0_i32 : i32, i32
  }
}

</mosaic_0001>

<bundles_post_ra>
// kernel: tpu_custom_call.1
= control target key start
LH: loop header
LB: loop body
LE: loop exit
PB: predicated region body
PF: predicated region fallthrough
CT: control target
= control target key end

     0   :  { %v216_v1 = vmov 0.0   ;;  %vm217_vm0 = vmmov 0   ;;  %s268_s0 = inlined_call_operand.vmem [shape: bf16[48,32], index: 0, kind: input, shape index: {}]   ;;  %s269_s1 = inlined_call_operand.vmem [shape: bf16[32,96], index: 1, kind: input, shape index: {}]   ;;  %s270_s2 = inlined_call_operand.vmem [shape: f32[1,96], index: 2, kind: input, shape index: {}]   ;;  %s271_s3 = inlined_call_operand.hbm [shape: f32[48,96], index: 3, kind: output, shape index: {}]  }
   0x1   :  { %v189_v0 = vld [vmem:[%s269_s1 + $0x8] sm:$0xff]   ;;  %180 = vmatprep.subr.bf16.mxu1 %v216_v1  ;;  %164 = vmatprep.subr.bf16.mxu0 %v216_v1  ;;  %v190_v2 = vld [vmem:[%s269_s1] sm:$0xff]  }
   0x2   :  { %182 = vmatpush3.bf16.msra.mxu1 %v189_v0  ;;  %165 = vmatpush3.bf16.msra.mxu0 %v189_v0  ;;  %v191_v3 = vld [vmem:[%s268_s0 + $0x8] sm:$0xff]   ;;  %v192_v4 = vld [vmem:[%s268_s0] sm:$0xff]  }
   0x3   :  { %181 = vmatprep.subr.bf16.mxu1 %v216_v1  ;;  %166 = vmatprep.subr.bf16.mxu0 %v216_v1 }
   0x4   :  { %172 = vmatprep.mubr.msk.bf16.mxu1 %vm217_vm0, %v216_v1  ;;  %168 = vmatprep.mubr.msk.bf16.mxu0 %vm217_vm0, %v216_v1 }
   0x5   :  { %8 = vsyncpa [#allocation3], 0  ;;  %vm60_vm1 = vcmask 261120   ;;  %v193_v5 = vld [vmem:[%s268_s0 + $0x10] sm:$0xff]   ;;  %v150_v6 = vld [vmem:[%s270_s2] ss:$0 sm:$0xff] }
   0x6   :  { %183 = vmatpush3.bf16.msra.mxu1 %v190_v2  ;;  %167 = vmatpush3.bf16.msra.mxu0 %v190_v2  ;;  %vm127_vm2 = vcmask 785408   ;;  %s218_s0 = smov [#allocation2]  }
   0x7   :  { %s139_s2 = sshll.u32 %s218_s0, 4  ;;  %s140_s2 = int_to_ptr.vmem [resolvable:$true] %s139_s2 }
   0x8   :  { %s194_s23 = scalar_lea.vmem %s140_s2, 768  ;;  %p199_p1 = scmp.lt.s32.totalorder %s140_s2, %s140_s2 }
   0x9   :  { %173 = vmatmul.mubr.msk.bf16.vlgmr.msra.gmra.mxu1 %vm60_vm1, %v191_v3  ;;  %169 = vmatmul.mubr.msk.bf16.vlgmr.msra.gmra.mxu0 %vm60_vm1, %v192_v4  ;;  %p195_p0 = scmp.ne.s32.totalorder %s140_s2, %s194_s23  ;;  %p200_p2 = scmp.lt.s32.totalorder %s194_s23, %s194_s23 }
   0xa   :  { %176 = vmatprep.mubr.msk.bf16.mxu1 %vm217_vm0, %v216_v1 }
   0xb   :  { %p201_p3 = por %p200_p2, %p199_p1 }
   0xd   :  { %p202_p4 = pnand %p201_p3, %p195_p0 }
  0x11   :  { %177 = vmatmul.mubr.msk.bf16.gmra.mxu1 %vm60_vm1, %v193_v5 }
  0xc9   :  { %v112_v7 = vpop.f32.mrf.mxu1  ;;  %v104_v8 = vpop.f32.mrf.mxu0 }
  0xca   :  { %v113_v9 = vadd.f32 %v150_v6, %v112_v7  ;;  %v105_v10 = vadd.f32 %v150_v6, %v104_v8 }
  0xcb   :  { %v174_v11 = vpop.f32.mrf.mxu1  ;;  %v170_v12 = vpop.f32.mrf.mxu0 }
  0xcc   :  { %130 = vst.msk [vmem:[#allocation2 + $0x10] sm:$0xff] %vm127_vm2, %v113_v9  ;;  %128 = vst.msk [vmem:[#allocation2] sm:$0xff] %vm127_vm2, %v105_v10 }
  0xcd   :  { %v115_v13 = vpop.f32.mrf.mxu1  ;;  %v107_v14 = vpop.f32.mrf.mxu0 }
  0xce   :  { %v116_v15 = vadd.f32 %v150_v6, %v115_v13  ;;  %v108_v16 = vadd.f32 %v150_v6, %v107_v14 }
  0xcf   :  { %v175_v17 = vpop.f32.mrf.mxu1  ;;  %v171_v18 = vpop.f32.mrf.mxu0 }
  0xd0   :  { %131 = vst.msk [vmem:[#allocation2 + $0x18] sm:$0xff] %vm127_vm2, %v116_v15  ;;  %129 = vst.msk [vmem:[#allocation2 + $0x8] sm:$0xff] %vm127_vm2, %v108_v16 }
  0xd1   :  { %v120_v19 = vpop.f32.mrf.mxu1 }
  0xd2   :  { %v121_v20 = vadd.f32 %v150_v6, %v120_v19 }
  0xd3   :  { %v178_v21 = vpop.f32.mrf.mxu1 }
  0xd4   :  { %132 = vst.msk [vmem:[#allocation2 + $0x20] sm:$0xff] %vm127_vm2, %v121_v20 }
  0xd5   :  { %v123_v22 = vpop.f32.mrf.mxu1 }
  0xd6   :  { %v124_v23 = vadd.f32 %v150_v6, %v123_v22 }
  0xd7   :  { %v179_v24 = vpop.f32.mrf.mxu1 }
  0xd8   :  { %133 = vst.msk [vmem:[#allocation2 + $0x28] sm:$0xff] %vm127_vm2, %v124_v23 }
  0xd9   :  { %205 = shalt.err (!%p202_p4)
}
  0xda   :  { %s219_s24 = smov 128   ;;  %s220_s25 = smov 8  }
  0xdb   :  { %145 = dma.vmem_to_hbm [thread:$0]  %s140_s2, 768, %s271_s3, [#allocation3], %s219_s24, %s219_s24, %s220_s25  }
  0xdc   :  { %214 = dma.done.wait [#allocation3], 768  }
  0xdd   :  { %215 = vsyncadd [#allocation3], 4294966528 }
  0xde   :  { %149 = vsyncpa [#allocation3], 1 }

</bundles_post_ra>
